<compile_context>
chip_gen: v5e
topology: v5e:2x2
jax: 0.10.0
libtpu: 0.0.40
codegen_flags: <defaults>
</compile_context>

<pallas_src>
import functools

import jax
import jax.numpy as jnp
from jax.experimental import pallas as pl
from jax.experimental.pallas import tpu as pltpu


def _mlp_kernel(x_ref, wgu_ref, wd_ref, o_ref, acc_ref):
    # x_ref:   (tm, H)      block of flattened activations (resident across i)
    # wgu_ref: (2, H, ti)   stacked [gate, up] weight tile, (in, out) layout
    # wd_ref:  (ti, H)      down_proj weight tile, (in, out) layout
    # o_ref:   (tm, H)      output block (same block index for every i -> resident)
    # acc_ref: (tm, H) f32  down_proj accumulator scratch
    i = pl.program_id(1)

    @pl.when(i == 0)
    def _():
        acc_ref[...] = jnp.zeros_like(acc_ref)

    x = x_ref[...]
    gate = jnp.dot(x, wgu_ref[0], preferred_element_type=jnp.float32)
    up = jnp.dot(x, wgu_ref[1], preferred_element_type=jnp.float32)

    # SiLU (ACT2FN["silu"]): g * sigmoid(g) in f32 (sigmoid -> EUP slot), then cast
    # back to the weight dtype for the MXU down-projection.
    h = (gate * jax.nn.sigmoid(gate)) * up
    acc_ref[...] += jnp.dot(h.astype(wd_ref.dtype), wd_ref[...],
                            preferred_element_type=jnp.float32)

    @pl.when(i == pl.num_programs(1) - 1)
    def _():
        o_ref[...] = acc_ref[...].astype(o_ref.dtype)


def prepare_llama_mlp_weights(wg, wu, wd):
    """One-time weight prep (do at load time, NOT per forward call).

    wg, wu: (I, H) torch Linear layout (out_features, in_features)
    wd:     (H, I) torch Linear layout
    Returns:
      wgu:  (2, H, I)  stacked [gate, up] in (in, out) layout
      wd_t: (I, H)     down_proj in (in, out) layout
    """
    wgu = jnp.stack([wg.T, wu.T], axis=0)
    wd_t = wd.T
    return wgu, wd_t


def _pick_tile(dim, target, align):
    """Largest multiple of `align` that divides `dim` and is <= target (else dim)."""
    if dim <= target:
        return dim
    t = (target // align) * align
    while t >= align:
        if dim % t == 0:
            return t
        t -= align
    return dim


def _vmem_estimate_bytes(tm, ti, H, itemsize):
    x_blk = tm * H * itemsize
    wgu_blk = 2 * H * ti * itemsize
    wd_blk = ti * H * itemsize
    out_blk = tm * H * itemsize
    acc = tm * H * 4
    # double-buffered pipeline buffers + resident f32 accumulator
    return 2 * (x_blk + wgu_blk + wd_blk + out_blk) + acc


# Conservative budget so tiles fit even on v7x (64 MiB physical VMEM per TC),
# leaving headroom for Mosaic internal scratch.
_VMEM_BUDGET = 44 * 1024 * 1024


def _choose_tiles(M, H, I, itemsize, block_m, block_i):
    tm = M if M <= block_m else block_m

    def pick_ti(tm_):
        ti = _pick_tile(I, block_i, 128)
        while ti > 128 and _vmem_estimate_bytes(tm_, ti, H, itemsize) > _VMEM_BUDGET:
            nxt = _pick_tile(I, ti - 128, 128)
            if nxt >= ti:   # no smaller 128-aligned divisor exists
                break
            ti = nxt
        return ti

    ti = pick_ti(tm)
    if _vmem_estimate_bytes(tm, ti, H, itemsize) > _VMEM_BUDGET and tm > 128:
        tm = 128
        ti = pick_ti(tm)
    return tm, ti


@functools.partial(jax.jit, static_argnames=("block_m", "block_i"))
def llama_mlp_forward(x, wgu, wd_t, *, block_m=256, block_i=512):
    """x: (B, S, H); wgu: (2, H, I); wd_t: (I, H) (from prepare_llama_mlp_weights)."""
    B, S, H = x.shape
    I = wgu.shape[-1]
    M = B * S
    x2d = x.reshape(M, H)

    itemsize = jnp.dtype(x.dtype).itemsize
    tm, ti = _choose_tiles(M, H, I, itemsize, block_m, block_i)

    grid = (pl.cdiv(M, tm), I // ti)

    cp_kwargs = dict(dimension_semantics=("parallel", "arbitrary"))
    est = _vmem_estimate_bytes(tm, ti, H, itemsize)
    if est > 16 * 1024 * 1024:
        # Raise the scoped-VMEM default only when the tiles actually need it
        # (default is 16 MiB on v5e, 32 MiB on v6e/v7x); stay under v7x's 64 MiB.
        cp_kwargs["vmem_limit_bytes"] = min(int(est * 1.3), 60 * 1024 * 1024)

    cost = pl.CostEstimate(
        flops=6 * M * H * I,                       # gate + up + down matmuls
        transcendentals=M * I,                     # sigmoid
        bytes_accessed=(2 * M * H + 3 * H * I) * itemsize,
    )

    out2d = pl.pallas_call(
        _mlp_kernel,
        out_shape=jax.ShapeDtypeStruct((M, H), x.dtype),
        grid_spec=pltpu.PrefetchScalarGridSpec(
            num_scalar_prefetch=0,
            grid=grid,
            in_specs=[
                pl.BlockSpec((tm, H), lambda m, i: (m, 0)),
                pl.BlockSpec((2, H, ti), lambda m, i: (0, 0, i)),
                pl.BlockSpec((ti, H), lambda m, i: (i, 0)),
            ],
            out_specs=pl.BlockSpec((tm, H), lambda m, i: (m, 0)),
            scratch_shapes=[pltpu.VMEM((tm, H), jnp.float32)],
        ),
        compiler_params=pltpu.CompilerParams(**cp_kwargs),
        cost_estimate=cost,
    )(x2d, wgu, wd_t)

    return out2d.reshape(B, S, H)


def _reference(x, wg, wu, wd):
    g = jnp.einsum("bsh,ih->bsi", x, wg)
    u = jnp.einsum("bsh,ih->bsi", x, wu)
    h = g * jax.nn.sigmoid(g) * u
    return jnp.einsum("bsi,hi->bsh", h, wd)


if __name__ == "__main__":
    # Small, MLP-shaped example: batch=2, seq=8, hidden=32, intermediate=64.
    B, S, H, I = 2, 8, 32, 64

    key = jax.random.PRNGKey(0)
    kx, kg, ku, kd = jax.random.split(key, 4)

    x = jax.random.normal(kx, (B, S, H), dtype=jnp.float32)
    # Weights in PyTorch Linear layout (out_features, in_features).
    wg = 0.05 * jax.random.normal(kg, (I, H), dtype=jnp.float32)  # gate_proj.weight
    wu = 0.05 * jax.random.normal(ku, (I, H), dtype=jnp.float32)  # up_proj.weight
    wd = 0.05 * jax.random.normal(kd, (H, I), dtype=jnp.float32)  # down_proj.weight

    # One-time weight prep (transpose + gate/up fusion) — outside the forward path.
    wgu, wd_t = prepare_llama_mlp_weights(wg, wu, wd)

    out = llama_mlp_forward(x, wgu, wd_t)
    out = jax.block_until_ready(out)

    ref = _reference(x, wg, wu, wd)
    assert out.shape == (B, S, H), out.shape
    assert jnp.allclose(out, ref, atol=1e-5, rtol=1e-5), (
        float(jnp.max(jnp.abs(out - ref)))
    )

    # TODO(synk): the quantized-layer (qera) fake-quant noise is checkpoint/config
    # dependent and has no clean synthetic equivalent; forward uses exact F.linear.
    print("KERNEL_OK")
</pallas_src>

<mosaic_0001>
module attributes {stable_mosaic.version = 11 : i64} {
  func.func @_mlp_kernel(%arg0: i32, %arg1: i32, %arg2: memref<16x32xf32, #tpu.memory_space<vmem>>, %arg3: memref<2x32x64xf32, #tpu.memory_space<vmem>>, %arg4: memref<64x32xf32, #tpu.memory_space<vmem>>, %arg5: memref<16x32xf32, #tpu.memory_space<vmem>>, %arg6: memref<16x32xf32, #tpu.memory_space<vmem>>) attributes {dimension_semantics = [#tpu.dimension_semantics<parallel>, #tpu.dimension_semantics<arbitrary>], iteration_bounds = array<i64: 1, 1>, scalar_prefetch = 0 : i64, scratch_operands = 1 : i64, tpu.core_type = #tpu.core_type<tc>, window_params = [{transform_indices = @transform_0, window_bounds = array<i64: 16, 32>}, {transform_indices = @transform_1, window_bounds = array<i64: 2, 32, 64>}, {transform_indices = @transform_2, window_bounds = array<i64: 64, 32>}, {transform_indices = @transform_3, window_bounds = array<i64: 16, 32>}]} {
    %c0_i32 = arith.constant 0 : i32
    %0 = arith.cmpi eq, %arg1, %c0_i32 : i32
    %1 = arith.extui %0 : i1 to i32
    %c0_i32_0 = arith.constant 0 : i32
    %2 = arith.cmpi ne, %1, %c0_i32_0 : i32
    scf.if %2 {
      %cst_18 = arith.constant 0.000000e+00 : f32
      %25 = vector.broadcast %cst_18 : f32 to vector<16x32xf32>
      %c0_19 = arith.constant 0 : index
      %c0_20 = arith.constant 0 : index
      %26 = vector.load %arg6[%c0_19, %c0_20] : memref<16x32xf32, #tpu.memory_space<vmem>>, vector<16x32xf32>
      tpu.vector_store %arg6[%c0_19, %c0_20], %25 {strides = array<i32>} : memref<16x32xf32, #tpu.memory_space<vmem>>, vector<16x32xf32>,
    } else {
    }
    %c0 = arith.constant 0 : index
    %c0_1 = arith.constant 0 : index
    %3 = vector.load %arg2[%c0, %c0_1] : memref<16x32xf32, #tpu.memory_space<vmem>>, vector<16x32xf32>
    %c0_2 = arith.constant 0 : index
    %c0_3 = arith.constant 0 : index
    %c0_4 = arith.constant 0 : index
    %4 = vector.load %arg3[%c0_2, %c0_3, %c0_4] : memref<2x32x64xf32, #tpu.memory_space<vmem>>, vector<1x32x64xf32>
    %5 = vector.shape_cast %4 : vector<1x32x64xf32> to vector<32x64xf32>
    %cst = arith.constant dense<0.000000e+00> : vector<16x64xf32>
    %6 = tpu.matmul %3, %5, %cst {dimension_numbers = #tpu.dot_dimension_numbers<[1], [0], [0], [1], [0, 0, 1, 1], [], []>} : vector<16x32xf32>, vector<32x64xf32>, vector<16x64xf32> -> vector<16x64xf32>
    %c1 = arith.constant 1 : index
    %c0_5 = arith.constant 0 : index
    %c0_6 = arith.constant 0 : index
    %7 = vector.load %arg3[%c1, %c0_5, %c0_6] : memref<2x32x64xf32, #tpu.memory_space<vmem>>, vector<1x32x64xf32>
    %8 = vector.shape_cast %7 : vector<1x32x64xf32> to vector<32x64xf32>
    %cst_7 = arith.constant dense<0.000000e+00> : vector<16x64xf32>
    %9 = tpu.matmul %3, %8, %cst_7 {dimension_numbers = #tpu.dot_dimension_numbers<[1], [0], [0], [1], [0, 0, 1, 1], [], []>} : vector<16x32xf32>, vector<32x64xf32>, vector<16x64xf32> -> vector<16x64xf32>
    %10 = arith.negf %6 : vector<16x64xf32>
    %11 = math.exp %10 : vector<16x64xf32>
    %cst_8 = arith.constant 1.000000e+00 : f32
    %12 = vector.broadcast %cst_8 : f32 to vector<16x64xf32>
    %13 = arith.addf %12, %11 : vector<16x64xf32>
    %14 = arith.divf %12, %13 : vector<16x64xf32>
    %15 = arith.mulf %6, %14 : vector<16x64xf32>
    %16 = arith.mulf %15, %9 : vector<16x64xf32>
    %c0_9 = arith.constant 0 : index
    %c0_10 = arith.constant 0 : index
    %17 = vector.load %arg6[%c0_9, %c0_10] : memref<16x32xf32, #tpu.memory_space<vmem>>, vector<16x32xf32>
    %c0_11 = arith.constant 0 : index
    %c0_12 = arith.constant 0 : index
    %18 = vector.load %arg4[%c0_11, %c0_12] : memref<64x32xf32, #tpu.memory_space<vmem>>, vector<64x32xf32>
    %cst_13 = arith.constant dense<0.000000e+00> : vector<16x32xf32>
    %19 = tpu.matmul %16, %18, %cst_13 {dimension_numbers = #tpu.dot_dimension_numbers<[1], [0], [0], [1], [0, 0, 1, 1], [], []>} : vector<16x64xf32>, vector<64x32xf32>, vector<16x32xf32> -> vector<16x32xf32>
    %20 = arith.addf %17, %19 : vector<16x32xf32>
    %c0_14 = arith.constant 0 : index
    %c0_15 = arith.constant 0 : index
    %21 = vector.load %arg6[%c0_14, %c0_15] : memref<16x32xf32, #tpu.memory_space<vmem>>, vector<16x32xf32>
    tpu.vector_store %arg6[%c0_14, %c0_15], %20 {strides = array<i32>} : memref<16x32xf32, #tpu.memory_space<vmem>>, vector<16x32xf32>,
    %c0_i32_16 = arith.constant 0 : i32
    %22 = arith.cmpi eq, %arg1, %c0_i32_16 : i32
    %23 = arith.extui %22 : i1 to i32
    %c0_i32_17 = arith.constant 0 : i32
    %24 = arith.cmpi ne, %23, %c0_i32_17 : i32
    scf.if %24 {
      %c0_18 = arith.constant 0 : index
      %c0_19 = arith.constant 0 : index
      %25 = vector.load %arg6[%c0_18, %c0_19] : memref<16x32xf32, #tpu.memory_space<vmem>>, vector<16x32xf32>
      %c0_20 = arith.constant 0 : index
      %c0_21 = arith.constant 0 : index
      %26 = vector.load %arg5[%c0_20, %c0_21] : memref<16x32xf32, #tpu.memory_space<vmem>>, vector<16x32xf32>
      tpu.vector_store %arg5[%c0_20, %c0_21], %25 {strides = array<i32>} : memref<16x32xf32, #tpu.memory_space<vmem>>, vector<16x32xf32>,
    } else {
    }
    return
  }
  func.func @transform_0(%arg0: i32, %arg1: i32) -> (i32, i32) {
    %c0_i32 = arith.constant 0 : i32
    %c0_i32_0 = arith.constant 0 : i32
    return %arg0, %c0_i32 : i32, i32
  }
  func.func @transform_1(%arg0: i32, %arg1: i32) -> (i32, i32, i32) {
    %c0_i32 = arith.constant 0 : i32
    %c0_i32_0 = arith.constant 0 : i32
    %c0_i32_1 = arith.constant 0 : i32
    return %c0_i32, %c0_i32_0, %arg1 : i32, i32, i32
  }
  func.func @transform_2(%arg0: i32, %arg1: i32) -> (i32, i32) {
    %c0_i32 = arith.constant 0 : i32
    %c0_i32_0 = arith.constant 0 : i32
    return %arg1, %c0_i32 : i32, i32
  }
  func.func @transform_3(%arg0: i32, %arg1: i32) -> (i32, i32) {
    %c0_i32 = arith.constant 0 : i32
    %c0_i32_0 = arith.constant 0 : i32
    return %arg0, %c0_i32 : i32, i32
  }
}

</mosaic_0001>

<bundles_post_ra>
// kernel: llama_mlp_forward.1
= control target key start
LH: loop header
LB: loop body
LE: loop exit
PB: predicated region body
PF: predicated region fallthrough
CT: control target
= control target key end

     0   :  { %s348_s0 = inlined_call_operand.vmem [shape: f32[16,32], index: 0, kind: input, shape index: {}]   ;;  %s349_s1 = inlined_call_operand.vmem [shape: f32[2,32,64], index: 1, kind: input, shape index: {}]   ;;  %s350_s2 = inlined_call_operand.vmem [shape: f32[64,32], index: 2, kind: input, shape index: {}]   ;;  %s351_s3 = inlined_call_operand.hbm [shape: f32[16,32], index: 3, kind: output, shape index: {}]  }
   0x1   :  { %v27_v0 = vld [vmem:[%s349_s1 + $0x18] sm:$0xff]  ;;  %v26_v1 = vld [vmem:[%s349_s1 + $0x10] sm:$0xff]  ;;  %v25_v2 = vld [vmem:[%s349_s1 + $0x8] sm:$0xff] }
   0x2   :  { %47 = vmatpush.msra.mxu0 %v27_v0  ;;  %v202_v3 = vld [vmem:[%s349_s1 + $0x38] sm:$0xff]  ;;  %v201_v4 = vld [vmem:[%s349_s1 + $0x30] sm:$0xff] }
   0x3   :  { %75 = vmatpush.msra.mxu1 %v202_v3 }
   0x4   :  { %48 = vmatpush.msra.mxu0 %v26_v1 }
   0x5   :  { %8 = vsyncpa [#allocation4], 0  ;;  %v24_v5 = vld [vmem:[%s349_s1] sm:$0xff]  ;;  %v200_v6 = vld [vmem:[%s349_s1 + $0x28] sm:$0xff]  ;;  %vm19_vm0 = vcmask 261120   ;;  %76 = vmatpush.msra.mxu1 %v201_v4  ;;  %v255_v24 = vmov 0.0  }
   0x6   :  { %49 = vmatpush.msra.mxu0 %v25_v2  ;;  %v22_v7 = vld [vmem:[%s348_s0] sm:$0xff]  ;;  %v23_v9 = vld [vmem:[%s348_s0 + $0x8] sm:$0xff]  ;;  %v137_v10 = vld [vmem:[%s350_s2 + $0x38] sm:$0xff]  ;;  %20 = vst.msk [vmem:[#allocation2] sm:$0xff] %vm19_vm0, %v255_v24  ;;  %vm138_vm5 = vcmask 523264   ;;  %s185_s22 = sshll.u32 %s351_s3, 4  ;;  %s186_s22 = int_to_ptr.hbm [resolvable:$true] %s185_s22 }
   0x7   :  { %v199_v8 = vld [vmem:[%s349_s1 + $0x20] sm:$0xff]  ;;  %77 = vmatpush.msra.mxu1 %v200_v6  ;;  %153 = vmatpush.msra.mxu2 %v137_v10  ;;  %v136_v11 = vld [vmem:[%s350_s2 + $0x30] sm:$0xff]  ;;  %v135_v12 = vld [vmem:[%s350_s2 + $0x28] sm:$0xff]  ;;  %21 = vst.msk [vmem:[#allocation2 + $0x8] sm:$0xff] %vm19_vm0, %v255_v24  ;;  %s257_s23 = smov 128   ;;  %s258_s24 = smov 8  }
   0x8   :  { %50 = vmatpush.msra.mxu0 %v24_v5  ;;  %209 = vmatpush.msra.mxu3 %v137_v10  ;;  %v134_v13 = vld [vmem:[%s350_s2 + $0x20] sm:$0xff]  ;;  %v133_v14 = vld [vmem:[%s350_s2 + $0x18] sm:$0xff]  ;;  %v132_v15 = vld [vmem:[%s350_s2 + $0x10] sm:$0xff] }
   0x9   :  { %197 = vmatmul.msk.f32.vlgmr.msra.gmra.mxu0 %vm19_vm0, %v22_v7  ;;  %78 = vmatpush.msra.mxu1 %v199_v8  ;;  %v131_v16 = vld [vmem:[%s350_s2 + $0x8] sm:$0xff]  ;;  %v130_v17 = vld [vmem:[%s350_s2] sm:$0xff]  ;;  %s256_s2 = smov [#allocation3]  }
   0xa   :  { %203 = vmatmul.msk.f32.vlgmr.msra.gmra.mxu1 %vm19_vm0, %v22_v7  ;;  %154 = vmatpush.msra.mxu2 %v136_v11  ;;  %s183_s19 = sshll.u32 %s256_s2, 4  ;;  %s184_s19 = int_to_ptr.vmem [resolvable:$true] %s183_s19 }
   0xb   :  { %210 = vmatpush.msra.mxu3 %v136_v11 }
   0xc   :  { %155 = vmatpush.msra.mxu2 %v135_v12 }
   0xd   :  { %211 = vmatpush.msra.mxu3 %v135_v12  ;;  %v128_v53 = vld [vmem:[#allocation2] sm:$0xff] }
   0xe   :  { %156 = vmatpush.msra.mxu2 %v134_v13  ;;  %v129_v56 = vld [vmem:[#allocation2 + $0x8] sm:$0xff] }
   0xf   :  { %212 = vmatpush.msra.mxu3 %v134_v13 }
  0x10   :  { %157 = vmatpush.msra.mxu2 %v133_v14 }
  0x11   :  { %198 = vmatmul.msk.f32.gmra.mxu0 %vm19_vm0, %v23_v9  ;;  %213 = vmatpush.msra.mxu3 %v133_v14 }
  0x12   :  { %204 = vmatmul.msk.f32.gmra.mxu1 %vm19_vm0, %v23_v9  ;;  %158 = vmatpush.msra.mxu2 %v132_v15 }
  0x13   :  { %214 = vmatpush.msra.mxu3 %v132_v15 }
  0x14   :  { %159 = vmatpush.msra.mxu2 %v131_v16 }
  0x15   :  { %215 = vmatpush.msra.mxu3 %v131_v16 }
  0x16   :  { %160 = vmatpush.msra.mxu2 %v130_v17 }
  0x17   :  { %216 = vmatpush.msra.mxu3 %v130_v17 }
  0x86   :  { %v52_v18 = vpop.f32.mrf.mxu0 }
  0x87   :  { %v205_v19 = vmul.f32 -1.442695, %v52_v18  ;;  %v80_v36 = vpop.f32.mrf.mxu1 }
  0x89   :  { %221 = vpow2.f32 %v205_v19 }
  0x8e   :  { %v55_v20 = vpop.f32.mrf.mxu0 }
  0x8f   :  { %v222_v21 = vpop.eup %221  ;;  %v206_v22 = vmul.f32 -1.442695, %v55_v20  ;;  %v83_v50 = vpop.f32.mrf.mxu1 }
  0x90   :  { %v92_v23 = vadd.f32 1.0, %v222_v21 }
  0x91   :  { %223 = vpow2.f32 %v206_v22 }
  0x92   :  { %225 = vrcp.f32 %v92_v23  ;;  %v105_v30 = vand.u32 2147483648, %v92_v23  ;;  %v103_v32 = vand.u32 2147483647, %v92_v23  ;;  %vm99_vm2 = vweird.f32 %v92_v23 }
  0x94   :  { %v106_v35 = vor.u32 1.1754944e-38, %v105_v30  ;;  %vm104_vm4 = vcmp.eq.f32.partialorder %v103_v32, 8.507059e+37 }
  0x97   :  { %v224_v25 = vpop.eup %223 }
  0x98   :  { %v226_v26 = vpop.eup %225  ;;  %v93_v27 = vadd.f32 1.0, %v224_v25 }
  0x99   :  { %v95_v28 = vmul.f32 %v226_v26, %v92_v23  ;;  %vm100_vm1 = vweird.f32 %v226_v26 }
  0x9a   :  { %227 = vrcp.f32 %v93_v27  ;;  %vm101_vm3 = vmor %vm99_vm2, %vm100_vm1  ;;  %v120_v42 = vand.u32 2147483648, %v93_v27  ;;  %v118_v44 = vand.u32 2147483647, %v93_v27  ;;  %vm114_vm7 = vweird.f32 %v93_v27 }
  0x9b   :  { %v96_v29 = vsub.f32 1.0, %v95_v28 }
  0x9c   :  { %v121_v47 = vor.u32 1.1754944e-38, %v120_v42  ;;  %vm119_vm9 = vcmp.eq.f32.partialorder %v118_v44, 8.507059e+37 }
  0x9d   :  { %v97_v31 = vmul.f32 %v226_v26, %v96_v29 }
  0x9f   :  { %v98_v33 = vadd.f32 %v226_v26, %v97_v31 }
  0xa0   :  { %v228_v34 = vpop.eup %227 }
  0xa1   :  { %v102_v37 = vsel %vm101_vm3, %v226_v26, %v98_v33  ;;  %v110_v38 = vmul.f32 %v228_v34, %v93_v27  ;;  %vm115_vm6 = vweird.f32 %v228_v34 }
  0xa2   :  { %v107_v39 = vsel %vm104_vm4, %v106_v35, %v102_v37  ;;  %vm116_vm8 = vmor %vm114_vm7, %vm115_vm6 }
  0xa3   :  { %v124_v40 = vmul.f32 %v107_v39, %v52_v18  ;;  %v111_v41 = vsub.f32 1.0, %v110_v38 }
  0xa5   :  { %v112_v43 = vmul.f32 %v228_v34, %v111_v41  ;;  %v126_v45 = vmul.f32 %v124_v40, %v80_v36 }
  0xa7   :  { %v113_v46 = vadd.f32 %v228_v34, %v112_v43  ;;  %207 = vmatmul.msk.f32.vlgmr.msra.gmra.mxu2 %vm138_vm5, %v126_v45 }
  0xa9   :  { %v117_v48 = vsel %vm116_vm8, %v228_v34, %v113_v46 }
  0xaa   :  { %v122_v49 = vsel %vm119_vm9, %v121_v47, %v117_v48 }
  0xab   :  { %v125_v51 = vmul.f32 %v122_v49, %v55_v20 }
  0xad   :  { %v127_v52 = vmul.f32 %v125_v51, %v83_v50 }
  0xaf   :  { %208 = vmatmul.msk.f32.vlgmr.msra.gmra.mxu3 %vm138_vm5, %v127_v52 }
 0x12a   :  { %v162_v54 = vpop.f32.mrf.mxu2 }
 0x12b   :  { %v168_v55 = vadd.f32 %v162_v54, %v128_v53 }
 0x12d   :  { %170 = vst.msk [vmem:[#allocation2] sm:$0xff] %vm19_vm0, %v168_v55 }
 0x132   :  { %v165_v57 = vpop.f32.mrf.mxu3 }
 0x133   :  { %v169_v58 = vadd.f32 %v165_v57, %v129_v56 }
 0x134   :  { %v175_v59 = vld [vmem:[#allocation2] sm:$0xff] }
 0x135   :  { %171 = vst.msk [vmem:[#allocation2 + $0x8] sm:$0xff] %vm19_vm0, %v169_v58 }
 0x136   :  { %177 = vst.msk [vmem:[#allocation3] sm:$0xff] %vm19_vm0, %v175_v59 }
 0x13c   :  { %v176_v60 = vld [vmem:[#allocation2 + $0x8] sm:$0xff] }
 0x13d   :  { %178 = vst.msk [vmem:[#allocation3 + $0x8] sm:$0xff] %vm19_vm0, %v176_v60 }
 0x13e   :  { %191 = dma.vmem_to_hbm [thread:$0]  %s184_s19, 256, %s186_s22, [#allocation4], %s257_s23, %s257_s23, %s258_s24  }
 0x13f   :  { %253 = dma.done.wait [#allocation4], 256  }
 0x140   :  { %254 = vsyncadd [#allocation4], 4294967040 }
 0x141   :  { %196 = vsyncpa [#allocation4], 1 }

</bundles_post_ra>
